<compile_context>
chip_gen: v7x
topology: tpu7x:2x2x1
jax: 0.10.0
libtpu: 0.0.40
codegen_flags: <defaults>
</compile_context>

<pallas_src>
import functools

import jax
import jax.numpy as jnp
from jax.experimental import pallas as pl
from jax.experimental.pallas import tpu as pltpu


def _round_up(x: int, m: int) -> int:
    return ((x + m - 1) // m) * m


def _tile_bytes(rows: int, cols: int, itemsize: int = 4) -> int:
    """Approximate VMEM footprint of one (rows, cols) tile after (8, 128) layout padding."""
    return _round_up(rows, 8) * _round_up(cols, 128) * itemsize


def _bigram_loss_kernel(idx_ref, tgt_ref, table_ref, logits_ref, tileloss_ref, *,
                        n_valid: int):
    """One (TN, Vp) logits tile + a per-tile partial sum of cross-entropy terms."""
    i = pl.program_id(0)
    idx = idx_ref[...]        # (TN, 1) int32
    tgt = tgt_ref[...]        # (TN, 1) int32
    table = table_ref[...]    # (Vp, Vp) f32; padded columns pre-filled with -1e30

    tn = idx.shape[0]
    vp = table.shape[1]

    cols = jax.lax.broadcasted_iota(jnp.int32, (tn, vp), 1)        # lane (vocab) index

    # Embedding lookup == one-hot(idx) @ table on the MXU (exact: 1.0/0.0 weights).
    onehot = (cols == idx).astype(jnp.float32)                     # (TN, Vp)
    logits = jnp.dot(onehot, table, preferred_element_type=jnp.float32)
    logits_ref[...] = logits.astype(logits_ref.dtype)              # lane-dense (128-mult) store

    # Cross-entropy terms. Padded vocab columns carry -1e30 straight from the table,
    # so no extra masking pass is needed: exp(-1e30 - m) underflows to exactly 0.
    m = jnp.max(logits, axis=-1, keepdims=True)                                   # (TN, 1)
    lse = m + jnp.log(jnp.sum(jnp.exp(logits - m), axis=-1, keepdims=True))       # (TN, 1)
    picked = jnp.sum(jnp.where(cols == tgt, logits, 0.0), axis=-1, keepdims=True)  # (TN, 1)

    # Zero padded rows, reduce to a per-tile scalar, and emit one aligned (8, 128) block
    # (unmasked vst). The wrapper reads element [0, 0] of each tile's block.
    rows = jax.lax.broadcasted_iota(jnp.int32, (tn, 1), 0) + i * tn
    partial = jnp.sum(jnp.where(rows < n_valid, lse - picked, 0.0))
    tileloss_ref[...] = jnp.full((1, 8, 128), partial, dtype=jnp.float32)


def _bigram_logits_kernel(idx_ref, table_ref, logits_ref):
    """Inference path: embedding lookup only (no CE work at all)."""
    idx = idx_ref[...]        # (TN, 1) int32
    table = table_ref[...]    # (Vp, Vp) f32

    tn = idx.shape[0]
    vp = table.shape[1]

    cols = jax.lax.broadcasted_iota(jnp.int32, (tn, vp), 1)
    onehot = (cols == idx).astype(jnp.float32)
    logits = jnp.dot(onehot, table, preferred_element_type=jnp.float32)
    logits_ref[...] = logits.astype(logits_ref.dtype)


@functools.partial(jax.jit, static_argnames=("compute_loss", "logits_dtype"))
def _bigram_forward(idx, targets, table, *, compute_loss: bool, logits_dtype=jnp.float32):
    b, t = idx.shape
    n = b * t
    v = table.shape[0]

    # Lane-dense vocab axis. Do NOT pad further (e.g. to 256 for the v6e MXU): the
    # binding resource is the logits HBM write stream, not the matmul.
    vp = _round_up(v, 128)

    # Row tile: as big as reasonable (fewer per-grid-step fixed costs) but always >= 2
    # tiles so v7x's two TensorCores both get work under dimension_semantics=("parallel",).
    tn = min(2048, max(8, _round_up(-(-n // 2), 8)))
    n_pad = _round_up(n, tn)
    num_tiles = n_pad // tn

    # Fold the padded-vocab mask into the table: columns [v:vp) of the real rows get -1e30,
    # so the in-kernel logsumexp needs no select. Those columns are sliced off below.
    table_f32 = table.astype(jnp.float32)
    if vp > v:
        table_p = jnp.concatenate(
            [table_f32, jnp.full((v, vp - v), -1e30, dtype=jnp.float32)], axis=1)
    else:
        table_p = table_f32
    table_p = jnp.pad(table_p, ((0, vp - v), (0, 0)))

    idx_p = jnp.pad(idx.reshape(n).astype(jnp.int32), (0, n_pad - n)).reshape(n_pad, 1)

    # VMEM budget from the actual live set (default double-buffering on every operand),
    # capped at 75% of this generation's capacity (v5e/v6e 128 MiB, v7x 64 MiB per TC).
    try:
        vmem_cap = int(pltpu.get_tpu_info().vmem_capacity_bytes)
    except Exception:
        vmem_cap = 64 * 1024 * 1024  # conservative fallback (v7x per-TC)
    out_itemsize = jnp.dtype(logits_dtype).itemsize
    live_bytes = (2 * _tile_bytes(vp, vp)                    # resident table (double-buffered)
                  + 2 * _tile_bytes(tn, vp, out_itemsize)    # logits tile
                  + 4 * _tile_bytes(tn, 1)                   # idx + tgt tiles
                  + 2 * _tile_bytes(8, 128))                 # per-tile loss block
    vmem_limit = min((vmem_cap * 3) // 4, max(2 * live_bytes, 16 * 1024 * 1024))

    compiler_params = pltpu.CompilerParams(
        dimension_semantics=("parallel",),   # independent output tiles -> megacore-shardable
        vmem_limit_bytes=vmem_limit,
    )

    table_spec = pl.BlockSpec((vp, vp), lambda i: (0, 0))    # VMEM-resident across grid steps
    idx_spec = pl.BlockSpec((tn, 1), lambda i: (i, 0))
    logits_spec = pl.BlockSpec((tn, vp), lambda i: (i, 0))

    if compute_loss:
        tgt_p = jnp.pad(targets.reshape(n).astype(jnp.int32),
                        (0, n_pad - n)).reshape(n_pad, 1)
        kernel = functools.partial(_bigram_loss_kernel, n_valid=n)
        logits_p, tileloss = pl.pallas_call(
            kernel,
            grid=(num_tiles,),
            in_specs=[idx_spec, pl.BlockSpec((tn, 1), lambda i: (i, 0)), table_spec],
            out_specs=(logits_spec, pl.BlockSpec((1, 8, 128), lambda i: (i, 0, 0))),
            out_shape=(
                jax.ShapeDtypeStruct((n_pad, vp), logits_dtype),
                jax.ShapeDtypeStruct((num_tiles, 8, 128), jnp.float32),
            ),
            compiler_params=compiler_params,
        )(idx_p, tgt_p, table_p)
        logits = logits_p[:n, :v]
        loss = jnp.sum(tileloss[:, 0, 0]) / jnp.float32(n)   # per-tile partials, padded rows 0
        return logits, loss

    logits_p = pl.pallas_call(
        _bigram_logits_kernel,
        grid=(num_tiles,),
        in_specs=[idx_spec, table_spec],
        out_specs=logits_spec,
        out_shape=jax.ShapeDtypeStruct((n_pad, vp), logits_dtype),
        compiler_params=compiler_params,
    )(idx_p, table_p)
    return logits_p[:n, :v], None


class BigramLanguageModel:
    """JAX/Pallas port of the PyTorch BigramLanguageModel forward pass."""

    def __init__(self, num_tokens: int, key: jax.Array):
        # nn.Embedding default init: N(0, 1)
        self.num_tokens = num_tokens
        self.table = jax.random.normal(key, (num_tokens, num_tokens), dtype=jnp.float32)

    def __call__(self, idx, targets=None):
        b, t = idx.shape
        v = self.num_tokens
        if targets is None:
            logits, _ = _bigram_forward(idx, None, self.table, compute_loss=False)
            return logits.reshape(b, t, v), None
        logits, loss = _bigram_forward(idx, targets, self.table, compute_loss=True)
        # Matches PyTorch: when targets are given, the returned logits are the (B*T, C) view.
        return logits, loss


def _reference_forward(table, idx, targets):
    logits = table[idx]                                    # (B, T, V)
    b, t, v = logits.shape
    lf = logits.reshape(b * t, v)
    tf = targets.reshape(b * t)
    lse = jax.nn.logsumexp(lf, axis=-1)
    picked = jnp.take_along_axis(lf, tf[:, None], axis=-1)[:, 0]
    return lf, jnp.mean(lse - picked)


if __name__ == "__main__":
    num_tokens = 65   # Shakespeare char-level vocab size
    B, T = 2, 8

    key = jax.random.PRNGKey(0)
    k_table, k_idx, k_tgt, k_idx2, k_tgt2 = jax.random.split(key, 5)

    model = BigramLanguageModel(num_tokens, k_table)
    idx = jax.random.randint(k_idx, (B, T), 0, num_tokens, dtype=jnp.int32)
    targets = jax.random.randint(k_tgt, (B, T), 0, num_tokens, dtype=jnp.int32)

    # Forward with targets (training path)
    logits, loss = model(idx, targets)
    logits = jax.block_until_ready(logits)
    loss = jax.block_until_ready(loss)

    # Forward without targets (inference path, no CE work)
    logits_nt, loss_nt = model(idx, None)
    logits_nt = jax.block_until_ready(logits_nt)

    # Sanity check against a pure-JAX reference.
    ref_logits, ref_loss = _reference_forward(model.table, idx, targets)
    assert logits.shape == (B * T, num_tokens)
    assert logits_nt.shape == (B, T, num_tokens)
    assert loss_nt is None
    assert jnp.allclose(logits, ref_logits, atol=1e-5, rtol=1e-5)
    assert jnp.allclose(logits_nt.reshape(B * T, num_tokens), ref_logits, atol=1e-5, rtol=1e-5)
    assert jnp.allclose(loss, ref_loss, atol=1e-5, rtol=1e-5)

    # Multi-tile check (still small): exercises the >=2-tile grid / megacore path.
    B2, T2 = 4, 256
    idx2 = jax.random.randint(k_idx2, (B2, T2), 0, num_tokens, dtype=jnp.int32)
    tgt2 = jax.random.randint(k_tgt2, (B2, T2), 0, num_tokens, dtype=jnp.int32)
    logits2, loss2 = model(idx2, tgt2)
    logits2 = jax.block_until_ready(logits2)
    loss2 = jax.block_until_ready(loss2)
    ref_logits2, ref_loss2 = _reference_forward(model.table, idx2, tgt2)
    assert jnp.allclose(logits2, ref_logits2, atol=1e-5, rtol=1e-5)
    assert jnp.allclose(loss2, ref_loss2, atol=1e-4, rtol=1e-4)

    print("KERNEL_OK")
</pallas_src>

<mosaic_0001>
module attributes {stable_mosaic.version = 11 : i64} {
  func.func @_bigram_loss_kernel(%arg0: i32, %arg1: memref<8x1xi32, #tpu.memory_space<vmem>>, %arg2: memref<8x1xi32, #tpu.memory_space<vmem>>, %arg3: memref<128x128xf32, #tpu.memory_space<vmem>>, %arg4: memref<8x128xf32, #tpu.memory_space<vmem>>, %arg5: memref<1x8x128xf32, #tpu.memory_space<vmem>>) attributes {dimension_semantics = [#tpu.dimension_semantics<parallel>], iteration_bounds = array<i64: 2>, scalar_prefetch = 0 : i64, scratch_operands = 0 : i64, tpu.core_type = #tpu.core_type<tc>, window_params = [{transform_indices = @transform_0, window_bounds = array<i64: 8, 1>}, {transform_indices = @transform_1, window_bounds = array<i64: 8, 1>}, {pipeline_mode = #tpu.pipeline_mode<synchronous>, transform_indices = @transform_2, window_bounds = array<i64: 128, 128>}, {transform_indices = @transform_3, window_bounds = array<i64: 8, 128>}, {transform_indices = @transform_4, window_bounds = array<i64: 1, 8, 128>}]} {
    %c0 = arith.constant 0 : index
    %c0_0 = arith.constant 0 : index
    %0 = vector.load %arg1[%c0, %c0_0] : memref<8x1xi32, #tpu.memory_space<vmem>>, vector<8x1xi32>
    %c0_1 = arith.constant 0 : index
    %c0_2 = arith.constant 0 : index
    %1 = vector.load %arg2[%c0_1, %c0_2] : memref<8x1xi32, #tpu.memory_space<vmem>>, vector<8x1xi32>
    %c0_3 = arith.constant 0 : index
    %c0_4 = arith.constant 0 : index
    %2 = vector.load %arg3[%c0_3, %c0_4] : memref<128x128xf32, #tpu.memory_space<vmem>>, vector<128x128xf32>
    %3 = tpu.iota {dimensions = array<i32: 1>} : vector<8x128xi32>
    %4 = vector.broadcast %0 : vector<8x1xi32> to vector<8x128xi32>
    %5 = arith.cmpi eq, %3, %4 : vector<8x128xi32>
    %6 = arith.extui %5 : vector<8x128xi1> to vector<8x128xi32>
    %7 = arith.sitofp %6 : vector<8x128xi32> to vector<8x128xf32>
    %cst = arith.constant dense<0.000000e+00> : vector<8x128xf32>
    %8 = tpu.matmul %7, %2, %cst {dimension_numbers = #tpu.dot_dimension_numbers<[1], [0], [0], [1], [0, 0, 1, 1], [], []>} : vector<8x128xf32>, vector<128x128xf32>, vector<8x128xf32> -> vector<8x128xf32>
    %c0_5 = arith.constant 0 : index
    %c0_6 = arith.constant 0 : index
    %9 = vector.load %arg4[%c0_5, %c0_6] : memref<8x128xf32, #tpu.memory_space<vmem>>, vector<8x128xf32>
    tpu.vector_store %arg4[%c0_5, %c0_6], %8 {strides = array<i32>} : memref<8x128xf32, #tpu.memory_space<vmem>>, vector<8x128xf32>,
    %cst_7 = arith.constant dense<0xFF800000> : vector<8xf32>
    %10 = vector.multi_reduction <maximumf>, %8, %cst_7 [1] : vector<8x128xf32> to vector<8xf32>
    %11 = vector.shape_cast %10 : vector<8xf32> to vector<8x1xf32>
    %12 = vector.broadcast %11 : vector<8x1xf32> to vector<8x128xf32>
    %13 = arith.subf %8, %12 : vector<8x128xf32>
    %14 = math.exp %13 : vector<8x128xf32>
    %cst_8 = arith.constant dense<0.000000e+00> : vector<8xf32>
    %15 = vector.multi_reduction <add>, %14, %cst_8 [1] : vector<8x128xf32> to vector<8xf32>
    %16 = vector.shape_cast %15 : vector<8xf32> to vector<8x1xf32>
    %17 = math.log %16 : vector<8x1xf32>
    %18 = arith.addf %11, %17 : vector<8x1xf32>
    %19 = vector.broadcast %1 : vector<8x1xi32> to vector<8x128xi32>
    %20 = arith.cmpi eq, %3, %19 : vector<8x128xi32>
    %cst_9 = arith.constant 0.000000e+00 : f32
    %21 = vector.broadcast %cst_9 : f32 to vector<8x128xf32>
    %22 = arith.select %20, %8, %21 : vector<8x128xi1>, vector<8x128xf32>
    %cst_10 = arith.constant dense<0.000000e+00> : vector<8xf32>
    %23 = vector.multi_reduction <add>, %22, %cst_10 [1] : vector<8x128xf32> to vector<8xf32>
    %24 = vector.shape_cast %23 : vector<8xf32> to vector<8x1xf32>
    %25 = tpu.iota {dimensions = array<i32: 0>} : vector<8x1xi32>
    %c8_i32 = arith.constant 8 : i32
    %26 = arith.muli %arg0, %c8_i32 : i32
    %27 = vector.broadcast %26 : i32 to vector<8x1xi32>
    %28 = arith.addi %25, %27 : vector<8x1xi32>
    %c16_i32 = arith.constant 16 : i32
    %29 = vector.broadcast %c16_i32 : i32 to vector<8x1xi32>
    %30 = arith.cmpi slt, %28, %29 : vector<8x1xi32>
    %31 = arith.subf %18, %24 : vector<8x1xf32>
    %cst_11 = arith.constant 0.000000e+00 : f32
    %32 = vector.broadcast %cst_11 : f32 to vector<8x1xf32>
    %33 = arith.select %30, %31, %32 : vector<8x1xi1>, vector<8x1xf32>
    %34 = vector.shape_cast %33 : vector<8x1xf32> to vector<1x8x1xf32>
    %cst_12 = arith.constant dense<0.000000e+00> : vector<1xf32>
    %35 = vector.multi_reduction <add>, %34, %cst_12 [1, 2] : vector<1x8x1xf32> to vector<1xf32>
    %36 = vector.shape_cast %35 : vector<1xf32> to vector<1x1x1xf32>
    %37 = vector.extract %36[0, 0, 0] : f32 from vector<1x1x1xf32>
    %38 = vector.broadcast %37 : f32 to vector<1x8x128xf32>
    %c0_13 = arith.constant 0 : index
    %c0_14 = arith.constant 0 : index
    %c0_15 = arith.constant 0 : index
    %39 = vector.load %arg5[%c0_13, %c0_14, %c0_15] : memref<1x8x128xf32, #tpu.memory_space<vmem>>, vector<1x8x128xf32>
    tpu.vector_store %arg5[%c0_13, %c0_14, %c0_15], %38 {strides = array<i32>} : memref<1x8x128xf32, #tpu.memory_space<vmem>>, vector<1x8x128xf32>,
    return
  }
  func.func @transform_0(%arg0: i32) -> (i32, i32) {
    %c0_i32 = arith.constant 0 : i32
    %c0_i32_0 = arith.constant 0 : i32
    return %arg0, %c0_i32 : i32, i32
  }
  func.func @transform_1(%arg0: i32) -> (i32, i32) {
    %c0_i32 = arith.constant 0 : i32
    %c0_i32_0 = arith.constant 0 : i32
    return %arg0, %c0_i32 : i32, i32
  }
  func.func @transform_2(%arg0: i32) -> (i32, i32) {
    %c0_i32 = arith.constant 0 : i32
    %c0_i32_0 = arith.constant 0 : i32
    %c0_i32_1 = arith.constant 0 : i32
    return %c0_i32, %c0_i32_0 : i32, i32
  }
  func.func @transform_3(%arg0: i32) -> (i32, i32) {
    %c0_i32 = arith.constant 0 : i32
    %c0_i32_0 = arith.constant 0 : i32
    return %arg0, %c0_i32 : i32, i32
  }
  func.func @transform_4(%arg0: i32) -> (i32, i32, i32) {
    %c0_i32 = arith.constant 0 : i32
    %c0_i32_0 = arith.constant 0 : i32
    %c0_i32_1 = arith.constant 0 : i32
    return %arg0, %c0_i32, %c0_i32_0 : i32, i32, i32
  }
}

</mosaic_0001>

<bundles_post_ra>
// kernel: _bigram_forward.1
= control target key start
LH: loop header
LB: loop body
LE: loop exit
PB: predicated region body
PF: predicated region fallthrough
CT: control target
= control target key end

     0   :  { %10 = vsyncpa [#allocation3], 0  ;;  %s871_s0 = inlined_call_operand.vmem [shape: s32[16,1], index: 0, kind: input, shape index: {}]   ;;  %s872_s1 = inlined_call_operand.vmem [shape: s32[16,1], index: 1, kind: input, shape index: {}]   ;;  %s873_s2 = inlined_call_operand.vmem [shape: f32[128,128], index: 2, kind: input, shape index: {}]   ;;  %s874_s3 = inlined_call_operand.hbm [shape: f32[16,128], index: 3, kind: output, shape index: {0}]   ;;  %s875_s4 = inlined_call_operand.vmem [shape: f32[2,8,128], index: 4, kind: output, shape index: {1}]  }
   0x1   :  { %12 = vsyncpa [#allocation3 + $0x1], 0  ;;  %s710_s15 = smov 0   ;;  %s712_s16 = smov 0  }
   0x2   :  { %s714_s17 = smov 0   ;;  %s716_s18 = smov 0  }
   0x3 LB: > { %s731_s19 = sadd.s32 4294967295, %s677_s18   ;;  %s472_s20 = sadd.s32 4294967294, %s677_s18   ;;  %s677_s18 = sphi %s716_s18, %s881_s18   ;;  %s673_s17 = sphi %s714_s17, %s880_s17   ;;  %s669_s16 = sphi %s712_s16, %s879_s16   ;;  %s665_s15 = sphi %s710_s15, %s878_s15  }
   0x4   : > { %s735_s21 = sadd.s32 1, %s677_s18   ;;  %s98_s22 = sadd.s32 1, %s673_s17 }
   0x5   : > { %s95_s23 = ssub.s32 %s677_s18, %s735_s21  ;;  %p108_p0 = scmp.ne.s32.totalorder %s673_s17, %s669_s16 }
   0x6   : > { %p96_p1 = scmp.eq.s32.totalorder %s95_s23, 0  ;;  %p109_p2 = scmp.eq.s32.totalorder %s731_s19, 1 }
   0x7   : > { %p114_p3 = scmp.ne.s32.totalorder %s669_s16, %s665_s15  ;;  %p115_p4 = scmp.eq.s32.totalorder %s472_s20, 1 }
   0x8   : > { %s746_s24 = scalar_select %p96_p1, %s673_s17, %s98_s22  }
   0x9   : > { %p748_p5 = por %p109_p2, %p108_p0  ;;  %p752_p6 = por %p115_p4, %p114_p3 }
   0xa   : > { %p475_p7 = scmp.ge.s32.totalorder %s677_s18, 1  ;;  %p176_p8 = scmp.lt.s32.totalorder %s677_s18, 3 }
   0xc   : > { %p177_p9 = pnand %p475_p7, %p176_p8 }
   0xd   : > { %p209_p10 = scmp.lt.s32.totalorder (!%p177_p9), %s731_s19, 1  ;;  %v223_v0 = vld [vmem:[%s873_s2] sm:$0xff] (!%p177_p9)  ;;  %v224_v1 = vld [vmem:[%s873_s2 + $0x8] sm:$0xff] (!%p177_p9)  ;;  %v225_v2 = vld [vmem:[%s873_s2 + $0x10] sm:$0xff] (!%p177_p9)  ;;  %v679_v3 = vmov (!%p177_p9), 0   ;;  %v680_v4 = vmov (!%p177_p9), 0.0|0.0   ;;  %v239_v29 = vlaneseq (!%p177_p9) }
   0xe   : > { %180 = sbr.rel (%p177_p9) target bundleno = 891 (0x37b), region = 32  ;;  %609 = vset.pattern.permute.xlu0 (!%p177_p9), %v679_v3  ;;  %539 = vmatprep.subr.bf16.mxu0 (!%p177_p9), %v680_v4  ;;  %v540_v5 = vpack.c.bf16 (!%p177_p9), %v224_v1, %v223_v0  ;;  %v226_v6 = vld [vmem:[%s873_s2 + $0x18] sm:$0xff] (!%p177_p9)  ;;  %v227_v8 = vld [vmem:[%s873_s2 + $0x20] sm:$0xff] (!%p177_p9)  ;;  %v228_v9 = vld [vmem:[%s873_s2 + $0x28] sm:$0xff] (!%p177_p9)  ;;  %vm681_vm0 = vmmov (!%p177_p9), 0   ;;  %v682_v14 = vmov (!%p177_p9), 0.0  }
   0xf   : > { %610 = vset.pattern.permute.xlu1 (!%p177_p9), %v679_v3  ;;  %v543_v7 = vpack.c.bf16 (!%p177_p9), %v226_v6, %v225_v2  ;;  %v546_v11 = vpack.c.bf16 (!%p177_p9), %v228_v9, %v227_v8  ;;  %v229_v12 = vld [vmem:[%s873_s2 + $0x30] sm:$0xff] (!%p177_p9)  ;;  %v230_v13 = vld [vmem:[%s873_s2 + $0x38] sm:$0xff] (!%p177_p9)  ;;  %536 = vmatprep.mubr.msk.f32.mxu0 (!%p177_p9), %vm681_vm0, %v682_v14  ;;  %v231_v17 = vld [vmem:[%s873_s2 + $0x40] sm:$0xff] (!%p177_p9)  ;;  %v240_v30 = vand.u32 (!%p177_p9), 127, %v239_v29  ;;  %v683_v32 = vmov (!%p177_p9), 1.0   ;;  %s200_s8 = sand.u32 (!%p177_p9), 1, %s669_s16  }
  0x10   : > { %541 = vmatpush3.bf16.msra.mxu0 (!%p177_p9), %v540_v5  ;;  %v549_v16 = vpack.c.bf16 (!%p177_p9), %v230_v13, %v229_v12  ;;  %v232_v18 = vld [vmem:[%s873_s2 + $0x48] sm:$0xff] (!%p177_p9)  ;;  %v233_v20 = vld [vmem:[%s873_s2 + $0x50] sm:$0xff] (!%p177_p9)  ;;  %v234_v21 = vld [vmem:[%s873_s2 + $0x58] sm:$0xff] (!%p177_p9)  ;;  %s482_s12 = sshll.u32 (!%p177_p9), %s731_s19, 3  ;;  %v336_v42 = vshrl.u32 (!%p177_p9), %v239_v29, 7  ;;  %vm343_vm4 = vcmask (!%p177_p9), 7168  }
  0x11   : > { %542 = vmatprep.subr.bf16.mxu0 (!%p177_p9), %v680_v4  ;;  %v552_v19 = vpack.c.bf16 (!%p177_p9), %v232_v18, %v231_v17  ;;  %v555_v22 = vpack.c.bf16 (!%p177_p9), %v234_v21, %v233_v20  ;;  %v235_v23 = vld [vmem:[%s873_s2 + $0x60] sm:$0xff] (!%p177_p9)  ;;  %v236_v24 = vld [vmem:[%s873_s2 + $0x68] sm:$0xff] (!%p177_p9)  ;;  %v237_v26 = vld [vmem:[%s873_s2 + $0x70] sm:$0xff] (!%p177_p9)  ;;  %v338_v43 = vstv (!%p177_p9), %s482_s12  ;;  %s484_s13 = sshll.u32 (!%p177_p9), %s731_s19, 7  ;;  %s357_s27 = scalar_lea.sflag (!%p177_p9), [#allocation3], %s200_s8 }
  0x12   : > { %v558_v25 = vpack.c.bf16 (!%p177_p9), %v236_v24, %v235_v23  ;;  %v238_v27 = vld [vmem:[%s873_s2 + $0x78] sm:$0xff] (!%p177_p9)  ;;  %v339_v45 = vadd.s32 (!%p177_p9), %v338_v43, %v336_v42  ;;  %s684_s29 = smov (!%p177_p9), [#allocation2]  }
  0x13   : > { %v561_v28 = vpack.c.bf16 (!%p177_p9), %v238_v27, %v237_v26  ;;  %s619_s30 = sshll.u32 (!%p177_p9), %s684_s29, 4  ;;  %s620_s30 = int_to_ptr.vmem [resolvable:$false] %s619_s30 }
  0x14   : > { %544 = vmatpush3.bf16.msra.mxu0 (!%p177_p9), %v543_v7  ;;  %vm340_vm3 = vcmp.lt.s32.totalorder (!%p177_p9), %v339_v45, 16  ;;  %s621_s5 = scalar_lea.vmem (!%p177_p9), %s620_s30, 256 }
  0x15   : > { %s210_s9 = scalar_select %p209_p10, %s731_s19, 1  ;;  %545 = vmatprep.subr.bf16.mxu0 %v680_v4 }
  0x17   : > { %s772_s10 = sshll.u32 %s210_s9, 3  ;;  %s821_s9 = sshll.u32 %s200_s8, 3 }
  0x18   : > { %s212_s23 = scalar_lea.vmem %s871_s0, %s772_s10  ;;  %s216_s7 = scalar_lea.vmem %s872_s1, %s772_s10  ;;  %547 = vmatpush3.bf16.msra.mxu0 %v546_v11 }
  0x19   : > { %v221_v10 = vld [vmem:[%s212_s23] sm:$0xff]  ;;  %548 = vmatprep.subr.bf16.mxu0 %v680_v4  ;;  %s202_s11 = scalar_lea.vmem [#allocation2], %s821_s9  ;;  %s829_s23 = scalar_lea.hbm %s874_s3, %s484_s13 }
  0x1a   : > { %242 = vperm.xlu0 %609, %v221_v10   ;;  %v222_v15 = vld [vmem:[%s216_s7] sm:$0xff]  ;;  %s374_s14 = sshll.u32 %s202_s11, 4  ;;  %s375_s14 = int_to_ptr.vmem [resolvable:$true] %s374_s14 }
  0x1b   : > { %329 = vperm.xlu1 %610, %v222_v15   ;;  %s615_s28 = scalar_lea.vmem %s375_s14, 128  ;;  %p622_p0 = scmp.lt.s32.totalorder %s375_s14, %s620_s30 }
  0x1c   : > { %550 = vmatpush3.bf16.msra.mxu0 %v549_v16  ;;  %p616_p11 = scmp.ne.s32.totalorder %s375_s14, %s615_s28  ;;  %p623_p1 = scmp.lt.s32.totalorder %s621_s5, %s615_s28 }
  0x1d   : > { %551 = vmatprep.subr.bf16.mxu0 %v680_v4 }
  0x1e   : > { %p617_p12 = pnand %p616_p11, %p748_p5  ;;  %p624_p2 = por %p623_p1, %p622_p0 }
  0x20   : > { %553 = vmatpush3.bf16.msra.mxu0 %v552_v19  ;;  %p618_p13 = pneg %p617_p12 }
  0x21   : > { %554 = vmatprep.subr.bf16.mxu0 %v680_v4 }
  0x22   : > { %p625_p3 = pnand %p624_p2, %p618_p13 }
  0x24   : > { %556 = vmatpush3.bf16.msra.mxu0 %v555_v22 }
  0x25   : > { %557 = vmatprep.subr.bf16.mxu0 %v680_v4 }
  0x28   : > { %559 = vmatpush3.bf16.msra.mxu0 %v558_v25 }
  0x29   : > { %560 = vmatprep.subr.bf16.mxu0 %v680_v4 }
  0x2c   : > { %562 = vmatpush3.bf16.msra.mxu0 %v561_v28 }
  0x99   : > { %v243_v31 = vpop.permute.xlu0 %242 }
  0x9a   : > { %vm244_vm1 = vcmp.eq.s32.totalorder %v240_v30, %v243_v31  ;;  %v330_v33 = vpop.permute.xlu1 %329 }
  0x9b   : > { %537 = vmatmul.mubr.msk.f32.vlgmr.msra.gmra.mrb[0].mxu0 %vm244_vm1, %v683_v32  ;;  %vm331_vm2 = vcmp.eq.s32.totalorder %v240_v30, %v330_v33 }
 0x16e   : > { %v313_v34 = vpop.f32.mrb[0].mxu0 }
 0x16f   : > { %318 = vmax.xlane.f32.xlu0 %v313_v34  ;;  %v538_v35 = vpop.f32.mrb[1].mxu0  ;;  %v332_v36 = vsel %vm331_vm2, %v313_v34, 0.0  ;;  %317 = vst [vmem:[%s202_s11] sm:$0xff] %v313_v34 }
 0x173   : > { %333 = vadd.xlane.f32.xlu0 %v332_v36 }
 0x1fc   : > { %v319_v37 = vpop.xlane.xlu0 %318 }
 0x1fd   : > { %v320_v38 = vsub.f32 %v313_v34, %v319_v37 }
 0x1ff   : > { %v321_v39 = vmul.f32 1.442695, %v320_v38 }
 0x200   : > { %v334_v48 = vpop.xlane.xlu0 %333 }
 0x201   : > { %611 = vpow2.f32 %v321_v39 }
 0x20b   : > { %v612_v40 = vpop.eup %611 }
 0x20c   : > { %323 = vadd.xlane.f32.xlu1 %v612_v40 }
 0x299   : > { %v324_v41 = vpop.xlane.xlu1 %323 }
 0x29a   : > { %613 = vlog2.f32 %v324_v41 }
 0x2a4   : > { %v614_v44 = vpop.eup %613 }
 0x2a5   : > { %v326_v46 = vmul.f32 0.6931472, %v614_v44 }
 0x2a7   : > { %v327_v47 = vadd.f32 %v326_v46, %v319_v37 }
 0x2a9   : > { %v341_v49 = vsub.f32 %v327_v47, %v334_v48 }
 0x2ab   : > { %v342_v50 = vsel %vm340_vm3, %v341_v49, 0.0 }
 0x2ac   : > { %v344_v51 = vsel %vm343_vm4, %v342_v50, 0.0 }
 0x2ad   : > { %345 = vadd.xlane.f32.xlu0 %v344_v51 }
 0x2ae   : > { %628 = shalt.err (!%p625_p3)
}
 0x2af   : > { %s629_s19 = scalar_lea.hbm %s829_s23, 128  ;;  %s633_s8 = scalar_lea.hbm %s874_s3, 256 }
 0x2b0   : > { %p630_p4 = scmp.ne.s32.totalorder %s829_s23, %s629_s19  ;;  %p634_p9 = scmp.lt.u32.totalorder %s829_s23, %s874_s3 }
 0x2b1   : > { %p635_p10 = scmp.lt.u32.totalorder %s633_s8, %s629_s19  ;;  %p637_p12 = scmp.lt.u32.totalorder %s629_s19, %s829_s23 }
 0x2b2   : > { %p631_p7 = pnand %p630_p4, %p748_p5 }
 0x2b3   : > { %p636_p11 = por %p635_p10, %p634_p9 }
 0x2b4   : > { %p632_p8 = pneg %p631_p7 }
 0x2b5   : > { %p638_p13 = por %p637_p12, %p636_p11 }
 0x2b7   : > { %p639_p0 = pnand %p638_p13, %p632_p8 }
 0x2b9   : > { %642 = shalt.err (!%p639_p0)
}
 0x2ba   : > { %565 = dma.vmem_to_hbm [thread:$0]  (%p748_p5), %s375_s14, 128, %s829_s23, %s357_s27  }
 0x2bb   : > { %s220_s20 = scalar_lea.vmem %s875_s4, %s772_s10 }
 0x33a   : > { %v346_v52 = vpop.xlane.xlu0 %345 }
 0x33b   : > { %v347_v53 = vrot.slane %v346_v52, 4 }
 0x33d   : > { %v348_v54 = vadd.f32 %v347_v53, %v346_v52 }
 0x33f   : > { %v349_v55 = vrot.slane %v348_v54, 2 }
 0x341   : > { %v350_v56 = vadd.f32 %v349_v55, %v348_v54 }
 0x343   : > { %v351_v57 = vrot.slane %v350_v56, 1 }
 0x345   : > { %v352_v58 = vadd.f32 %v351_v57, %v350_v56 }
 0x347   : > { %563 = vpush %v352_v58 }
 0x378   : > { %s564_s22 = spop %563 }
 0x379   : > { %v354_v59 = vstv %s564_s22 }
 0x37a   : > { %355 = vst [vmem:[%s220_s20] sm:$0xff] %v354_v59 }
 0x37b PF: > { %p571_p5 = scmp.ge.s32.totalorder %s677_s18, 2  ;;  %s389_s25 = sand.u32 1, %s665_s15  }
 0x37c   : > { %s390_s14 = scalar_lea.sflag [#allocation3], %s389_s25 }
 0x37d   : > { %p568_p1 = pnand %p571_p5, %p752_p6 }
 0x37f   : > { %660 = dma.done.wait (!%p568_p1), %s390_s14, 128  }
 0x380   : > { %662 = vsyncadd (!%p568_p1), %s390_s14, 4294967168  ;;  %p15_p2 = scmp.ge.s32.totalorder %s735_s21, 4   ;;  %s878_s15 = smov %s669_s16 }
 0x381   : > { %s879_s16 = smov %s673_s17  ;;  %s880_s17 = smov %s746_s24 }
 0x382   : > { %s881_s18 = smov %s735_s21  ;;  %17 = sbr.rel (!%p15_p2) target bundleno = 3 (0x3), region = 82 }
 0x389   :  { %402 = vsyncpa [#allocation3], 1 }
 0x38a   :  { %404 = vsyncpa [#allocation3 + $0x1], 1 }

</bundles_post_ra>
